<compile_context>
chip_gen: v6e
topology: v6e:2x2x1
jax: 0.10.0
libtpu: 0.0.40
codegen_flags: <defaults>
</compile_context>

<pallas_src>
import functools

import jax
import jax.numpy as jnp
from jax import lax
from jax.experimental import pallas as pl
from jax.experimental.pallas import tpu as pltpu


# --------------------------------------------------------------------------
# Pass 1: accumulate attention + GroupNorm statistics over HW tiles.
# --------------------------------------------------------------------------
def _stats_kernel(x_ref, w3_ref, wz_ref, pg_ref, us_ref, *, planes):
    # Grid = (batch, hw_tile); hw_tile is a reduction ("arbitrary") axis, the
    # two small outputs are accumulators resident in VMEM across it.
    @pl.when(pl.program_id(1) == 0)
    def _():
        pg_ref[...] = jnp.zeros_like(pg_ref)
        us_ref[...] = jnp.zeros_like(us_ref)

    x = x_ref[0]                                            # (tile_hw, Cin)

    # Fused t/p/g projection: a single wide-N MXU matmul, f32 accumulation.
    tpg = jnp.dot(x, w3_ref[...], preferred_element_type=jnp.float32)
    t = tpg[:, :planes]
    p = tpg[:, planes:2 * planes]
    g = tpg[:, 2 * planes:]

    # Grouped 1x1 conv as one dense matmul with a block-diagonal weight.
    u = jnp.dot(t.astype(wz_ref.dtype), wz_ref[...],
                preferred_element_type=jnp.float32)         # (tile_hw, Cin)

    # Per-column partial sums (f32). Group aggregation happens outside on a
    # tiny (B, planes)/(B, Cin) array, so no in-kernel lane-dim group slicing.
    pg_ref[0] += jnp.sum(p * g, axis=0, keepdims=True)      # (1, planes)
    us_ref[0] += jnp.concatenate(
        [jnp.sum(u, axis=0, keepdims=True),
         jnp.sum(u * u, axis=0, keepdims=True)], axis=0)    # (2, Cin)


# --------------------------------------------------------------------------
# Pass 2: out = A * u + B + x   (A/B fold att scale, GN normalization, affine)
# --------------------------------------------------------------------------
def _apply_kernel(x_ref, wt_ref, wz_ref, a_ref, b_ref, o_ref):
    x = x_ref[0]                                            # (tile_hw, Cin)
    t = jnp.dot(x, wt_ref[...], preferred_element_type=jnp.float32)
    u = jnp.dot(t.astype(wz_ref.dtype), wz_ref[...],
                preferred_element_type=jnp.float32)         # (tile_hw, Cin)
    # Single lane-dense store; residual add in f32.
    o_ref[0] = (u * a_ref[0] + b_ref[0]
                + x.astype(jnp.float32)).astype(o_ref.dtype)


def _pick_tile_hw(hw, cap=512):
    """Largest divisor of HW that is <= cap and a multiple of 8 (sublane),
    falling back to the full extent (which always satisfies layout rules)."""
    cap = min(cap, hw)
    for t in range(cap, 0, -1):
        if hw % t == 0 and (t % 8 == 0 or t == hw):
            return t
    return hw


def spatial_cgnl(x_nchw, wt, wp, wg, wz, gamma, beta, *, groups,
                 use_scale=False, eps=1e-5, compute_dtype=jnp.bfloat16,
                 tile_hw=None):
    """SpatialCGNL forward.

    x_nchw: (B, Cin, H, W).  PyTorch weight layouts:
      wt/wp/wg: (planes, Cin, 1, 1); wz: (Cin, planes//groups, 1, 1) (grouped);
      gamma/beta: (Cin,) GroupNorm affine.
    """
    b, cin, h, w = x_nchw.shape
    planes = wt.shape[0]
    hw = h * w
    assert planes % groups == 0 and cin % groups == 0
    cg_p = planes // groups
    cg_in = cin // groups

    if tile_hw is None:
        tile_hw = _pick_tile_hw(hw)
    assert hw % tile_hw == 0
    n_hw = hw // tile_hw

    # Channels-last, spatially flattened activations (channels on lanes).
    # NOTE: for very small Cin a (C, HW) layout would be more lane-dense; kept
    # channels-last since production Cin is typically >= 128.
    x_bhwc = jnp.transpose(x_nchw.reshape(b, cin, hw), (0, 2, 1))
    x_k = x_bhwc.astype(compute_dtype)

    # 1x1 conv weights as (Cin, planes) matmul operands; fuse t/p/g along N.
    wt_m = jnp.transpose(wt.reshape(planes, cin)).astype(jnp.float32)
    wp_m = jnp.transpose(wp.reshape(planes, cin)).astype(jnp.float32)
    wg_m = jnp.transpose(wg.reshape(planes, cin)).astype(jnp.float32)
    w3 = jnp.concatenate([wt_m, wp_m, wg_m], axis=1).astype(compute_dtype)
    wt_c = wt_m.astype(compute_dtype)

    # Grouped z-conv as a (planes, Cin) block-diagonal matrix.
    wz2 = wz.reshape(cin, cg_p).astype(jnp.float32)          # wz2[o, k]
    wz_bd = jnp.zeros((planes, cin), jnp.float32)
    for gi in range(groups):
        blk = jnp.transpose(wz2[gi * cg_in:(gi + 1) * cg_in, :])  # (cg_p, cg_in)
        wz_bd = wz_bd.at[gi * cg_p:(gi + 1) * cg_p,
                         gi * cg_in:(gi + 1) * cg_in].set(blk)
    wz_bd = wz_bd.astype(compute_dtype)

    itemsize = jnp.dtype(compute_dtype).itemsize
    flops1 = b * hw * (6 * cin * planes + 2 * planes * cin
                       + 2 * planes + 4 * cin)
    bytes1 = (b * hw * cin * itemsize
              + (3 * cin * planes + planes * cin) * itemsize
              + b * (planes + 2 * cin) * 4)
    flops2 = b * hw * (2 * cin * planes + 2 * planes * cin + 4 * cin)
    bytes2 = (b * hw * cin * (itemsize + 4)
              + 2 * cin * planes * itemsize + 2 * b * cin * 4)

    # ---- Pass 1: statistics --------------------------------------------
    pg_sum, u_stats = pl.pallas_call(
        functools.partial(_stats_kernel, planes=planes),
        out_shape=(jax.ShapeDtypeStruct((b, 1, planes), jnp.float32),
                   jax.ShapeDtypeStruct((b, 2, cin), jnp.float32)),
        grid_spec=pltpu.PrefetchScalarGridSpec(
            num_scalar_prefetch=0,
            grid=(b, n_hw),
            in_specs=[
                pl.BlockSpec((1, tile_hw, cin), lambda i, s: (i, s, 0)),
                pl.BlockSpec((cin, 3 * planes), lambda i, s: (0, 0)),
                pl.BlockSpec((planes, cin), lambda i, s: (0, 0)),
            ],
            out_specs=(
                pl.BlockSpec((1, 1, planes), lambda i, s: (i, 0, 0)),
                pl.BlockSpec((1, 2, cin), lambda i, s: (i, 0, 0)),
            ),
        ),
        compiler_params=pltpu.CompilerParams(
            dimension_semantics=("parallel", "arbitrary")),
        cost_estimate=pl.CostEstimate(flops=flops1, transcendentals=0,
                                      bytes_accessed=bytes1),
    )(x_k, w3, wz_bd)

    # ---- Tiny per-(batch, group) math in plain JAX (all f32) ------------
    att = jnp.sum(pg_sum[:, 0, :].reshape(b, groups, cg_p), axis=-1)   # (B, G)
    if use_scale:
        att = att / jnp.sqrt(jnp.float32(cg_p * hw))
    n_elems = jnp.float32(cg_in * hw)
    sum_u = jnp.sum(u_stats[:, 0, :].reshape(b, groups, cg_in), axis=-1)
    sumsq_u = jnp.sum(u_stats[:, 1, :].reshape(b, groups, cg_in), axis=-1)
    mu_u = sum_u / n_elems
    var_u = jnp.maximum(sumsq_u / n_elems - mu_u * mu_u, 0.0)
    # z = att * u  =>  mean_z = att*mu_u, var_z = att^2*var_u (biased, like GN)
    mean_z = att * mu_u
    var_z = att * att * var_u
    rstd = lax.rsqrt(var_z + jnp.float32(eps))

    gamma_f = gamma.reshape(cin).astype(jnp.float32)
    beta_f = beta.reshape(cin).astype(jnp.float32)
    att_c = jnp.repeat(att, cg_in, axis=1)                  # (B, Cin)
    mean_c = jnp.repeat(mean_z, cg_in, axis=1)
    rstd_c = jnp.repeat(rstd, cg_in, axis=1)
    a_coef = (att_c * rstd_c * gamma_f[None, :]).reshape(b, 1, cin)
    b_coef = (beta_f[None, :]
              - mean_c * rstd_c * gamma_f[None, :]).reshape(b, 1, cin)

    # ---- Pass 2: apply -----------------------------------------------------
    out = pl.pallas_call(
        _apply_kernel,
        out_shape=jax.ShapeDtypeStruct((b, hw, cin), jnp.float32),
        grid_spec=pltpu.PrefetchScalarGridSpec(
            num_scalar_prefetch=0,
            grid=(b, n_hw),
            in_specs=[
                pl.BlockSpec((1, tile_hw, cin), lambda i, s: (i, s, 0)),
                pl.BlockSpec((cin, planes), lambda i, s: (0, 0)),
                pl.BlockSpec((planes, cin), lambda i, s: (0, 0)),
                pl.BlockSpec((1, 1, cin), lambda i, s: (i, 0, 0)),
                pl.BlockSpec((1, 1, cin), lambda i, s: (i, 0, 0)),
            ],
            out_specs=pl.BlockSpec((1, tile_hw, cin), lambda i, s: (i, s, 0)),
        ),
        compiler_params=pltpu.CompilerParams(
            dimension_semantics=("parallel", "parallel")),
        cost_estimate=pl.CostEstimate(flops=flops2, transcendentals=0,
                                      bytes_accessed=bytes2),
    )(x_k, wt_c, wz_bd, a_coef, b_coef)

    return jnp.transpose(out, (0, 2, 1)).reshape(b, cin, h, w)


# --------------------------------------------------------------------------
# Pure-JAX reference mirroring the PyTorch forward (NCHW).
# --------------------------------------------------------------------------
def spatial_cgnl_reference(x, wt, wp, wg, wz, gamma, beta, *, groups,
                           use_scale=False, eps=1e-5):
    b, cin, h, w = x.shape
    planes = wt.shape[0]
    cg_p = planes // groups
    cg_in = cin // groups

    def conv1x1(inp, wmat):
        return jnp.einsum('bchw,oc->bohw', inp,
                          wmat.reshape(wmat.shape[0], -1))

    t = conv1x1(x, wt)
    p = conv1x1(x, wp)
    g = conv1x1(x, wg)

    ys = []
    for gi in range(groups):
        tg = t[:, gi * cg_p:(gi + 1) * cg_p].reshape(b, -1)
        pg = p[:, gi * cg_p:(gi + 1) * cg_p].reshape(b, -1)
        gg = g[:, gi * cg_p:(gi + 1) * cg_p].reshape(b, -1)
        att = jnp.sum(pg * gg, axis=1, keepdims=True)
        if use_scale:
            att = att / jnp.sqrt(jnp.float32(cg_p * h * w))
        ys.append((att * tg).reshape(b, cg_p, h, w))
    y = jnp.concatenate(ys, axis=1)

    zs = []
    for gi in range(groups):
        yg = y[:, gi * cg_p:(gi + 1) * cg_p]
        wzg = wz[gi * cg_in:(gi + 1) * cg_in, :, 0, 0]       # (cg_in, cg_p)
        zs.append(jnp.einsum('bchw,oc->bohw', yg, wzg))
    z = jnp.concatenate(zs, axis=1)

    zr = z.reshape(b, groups, -1)
    mean = zr.mean(axis=2, keepdims=True)
    var = zr.var(axis=2, keepdims=True)
    zn = ((zr - mean) / jnp.sqrt(var + eps)).reshape(b, cin, h, w)
    zn = zn * gamma.reshape(1, cin, 1, 1) + beta.reshape(1, cin, 1, 1)
    return zn + x


if __name__ == "__main__":
    # Small shapes consistent with the module: inplanes=8, planes=4, groups=2.
    b, inplanes, planes, groups, h, w = 2, 8, 4, 2, 16, 16
    use_scale = True

    key = jax.random.PRNGKey(0)
    kx, kt, kp, kg, kz, kgam, kbet = jax.random.split(key, 7)

    x = jax.random.normal(kx, (b, inplanes, h, w), jnp.float32)
    wt = 0.1 * jax.random.normal(kt, (planes, inplanes, 1, 1), jnp.float32)
    wp = 0.1 * jax.random.normal(kp, (planes, inplanes, 1, 1), jnp.float32)
    wg = 0.1 * jax.random.normal(kg, (planes, inplanes, 1, 1), jnp.float32)
    wz = 0.1 * jax.random.normal(kz, (inplanes, planes // groups, 1, 1),
                                 jnp.float32)
    gamma = 1.0 + 0.1 * jax.random.normal(kgam, (inplanes,), jnp.float32)
    beta = 0.1 * jax.random.normal(kbet, (inplanes,), jnp.float32)

    # 1) f32 compute path vs f32 reference (tolerance covers TPU default
    #    matmul-precision behavior on either side).
    out_f32 = spatial_cgnl(x, wt, wp, wg, wz, gamma, beta, groups=groups,
                           use_scale=use_scale, compute_dtype=jnp.float32)
    out_f32 = jax.block_until_ready(out_f32)
    ref = spatial_cgnl_reference(x, wt, wp, wg, wz, gamma, beta,
                                 groups=groups, use_scale=use_scale)
    ref = jax.block_until_ready(ref)
    if not jnp.allclose(out_f32, ref, rtol=1e-2, atol=2e-2):
        err = float(jnp.max(jnp.abs(out_f32 - ref)))
        raise AssertionError(f"f32 path mismatch vs reference (max abs {err})")

    # 2) default bf16 compute path vs reference evaluated on the same
    #    bf16-quantized inputs (isolates kernel math from quantization).
    q = lambda a: a.astype(jnp.bfloat16).astype(jnp.float32)
    out_bf16 = spatial_cgnl(x, wt, wp, wg, wz, gamma, beta, groups=groups,
                            use_scale=use_scale)
    out_bf16 = jax.block_until_ready(out_bf16)
    ref_q = spatial_cgnl_reference(q(x), q(wt), q(wp), q(wg), q(wz),
                                   gamma, beta, groups=groups,
                                   use_scale=use_scale)
    ref_q = jax.block_until_ready(ref_q)
    if not jnp.allclose(out_bf16, ref_q, rtol=1e-2, atol=3e-2):
        err = float(jnp.max(jnp.abs(out_bf16 - ref_q)))
        raise AssertionError(f"bf16 path mismatch vs reference (max abs {err})")

    print("KERNEL_OK")
</pallas_src>

<mosaic_0001>
module attributes {stable_mosaic.version = 11 : i64} {
  func.func @_stats_kernel(%arg0: i32, %arg1: i32, %arg2: memref<1x256x8xf32, #tpu.memory_space<vmem>>, %arg3: memref<8x12xf32, #tpu.memory_space<vmem>>, %arg4: memref<4x8xf32, #tpu.memory_space<vmem>>, %arg5: memref<1x1x4xf32, #tpu.memory_space<vmem>>, %arg6: memref<1x2x8xf32, #tpu.memory_space<vmem>>) attributes {dimension_semantics = [#tpu.dimension_semantics<parallel>, #tpu.dimension_semantics<arbitrary>], iteration_bounds = array<i64: 2, 1>, scalar_prefetch = 0 : i64, scratch_operands = 0 : i64, tpu.core_type = #tpu.core_type<tc>, window_params = [{transform_indices = @transform_0, window_bounds = array<i64: 1, 256, 8>}, {pipeline_mode = #tpu.pipeline_mode<synchronous>, transform_indices = @transform_1, window_bounds = array<i64: 8, 12>}, {pipeline_mode = #tpu.pipeline_mode<synchronous>, transform_indices = @transform_2, window_bounds = array<i64: 4, 8>}, {transform_indices = @transform_3, window_bounds = array<i64: 1, 1, 4>}, {transform_indices = @transform_4, window_bounds = array<i64: 1, 2, 8>}]} {
    %c0_i32 = arith.constant 0 : i32
    %0 = arith.cmpi eq, %arg1, %c0_i32 : i32
    %1 = arith.extui %0 : i1 to i32
    %c0_i32_0 = arith.constant 0 : i32
    %2 = arith.cmpi ne, %1, %c0_i32_0 : i32
    scf.if %2 {
      %cst_23 = arith.constant 0.000000e+00 : f32
      %33 = vector.broadcast %cst_23 : f32 to vector<1x1x4xf32>
      %c0_24 = arith.constant 0 : index
      %c0_25 = arith.constant 0 : index
      %c0_26 = arith.constant 0 : index
      %34 = vector.load %arg5[%c0_24, %c0_25, %c0_26] : memref<1x1x4xf32, #tpu.memory_space<vmem>>, vector<1x1x4xf32>
      tpu.vector_store %arg5[%c0_24, %c0_25, %c0_26], %33 {strides = array<i32>} : memref<1x1x4xf32, #tpu.memory_space<vmem>>, vector<1x1x4xf32>,
      %cst_27 = arith.constant 0.000000e+00 : f32
      %35 = vector.broadcast %cst_27 : f32 to vector<1x2x8xf32>
      %c0_28 = arith.constant 0 : index
      %c0_29 = arith.constant 0 : index
      %c0_30 = arith.constant 0 : index
      %36 = vector.load %arg6[%c0_28, %c0_29, %c0_30] : memref<1x2x8xf32, #tpu.memory_space<vmem>>, vector<1x2x8xf32>
      tpu.vector_store %arg6[%c0_28, %c0_29, %c0_30], %35 {strides = array<i32>} : memref<1x2x8xf32, #tpu.memory_space<vmem>>, vector<1x2x8xf32>,
    } else {
    }
    %c0 = arith.constant 0 : index
    %c0_1 = arith.constant 0 : index
    %c0_2 = arith.constant 0 : index
    %3 = vector.load %arg2[%c0, %c0_1, %c0_2] : memref<1x256x8xf32, #tpu.memory_space<vmem>>, vector<1x256x8xf32>
    %4 = vector.shape_cast %3 : vector<1x256x8xf32> to vector<256x8xf32>
    %c0_3 = arith.constant 0 : index
    %c0_4 = arith.constant 0 : index
    %5 = vector.load %arg3[%c0_3, %c0_4] : memref<8x12xf32, #tpu.memory_space<vmem>>, vector<8x12xf32>
    %cst = arith.constant dense<0.000000e+00> : vector<256x12xf32>
    %6 = tpu.matmul %4, %5, %cst {dimension_numbers = #tpu.dot_dimension_numbers<[1], [0], [0], [1], [0, 0, 1, 1], [], []>} : vector<256x8xf32>, vector<8x12xf32>, vector<256x12xf32> -> vector<256x12xf32>
    %7 = vector.extract_strided_slice %6 {offsets = [0, 0], sizes = [256, 4], strides = [1, 1]} : vector<256x12xf32> to vector<256x4xf32>
    %8 = vector.extract_strided_slice %6 {offsets = [0, 4], sizes = [256, 4], strides = [1, 1]} : vector<256x12xf32> to vector<256x4xf32>
    %9 = vector.extract_strided_slice %6 {offsets = [0, 8], sizes = [256, 4], strides = [1, 1]} : vector<256x12xf32> to vector<256x4xf32>
    %c0_5 = arith.constant 0 : index
    %c0_6 = arith.constant 0 : index
    %10 = vector.load %arg4[%c0_5, %c0_6] : memref<4x8xf32, #tpu.memory_space<vmem>>, vector<4x8xf32>
    %cst_7 = arith.constant dense<0.000000e+00> : vector<256x8xf32>
    %11 = tpu.matmul %7, %10, %cst_7 {dimension_numbers = #tpu.dot_dimension_numbers<[1], [0], [0], [1], [0, 0, 1, 1], [], []>} : vector<256x4xf32>, vector<4x8xf32>, vector<256x8xf32> -> vector<256x8xf32>
    %c0_8 = arith.constant 0 : index
    %c0_9 = arith.constant 0 : index
    %c0_10 = arith.constant 0 : index
    %12 = vector.load %arg5[%c0_8, %c0_9, %c0_10] : memref<1x1x4xf32, #tpu.memory_space<vmem>>, vector<1x1x4xf32>
    %13 = vector.shape_cast %12 : vector<1x1x4xf32> to vector<1x4xf32>
    %14 = arith.mulf %8, %9 : vector<256x4xf32>
    %cst_11 = arith.constant dense<0.000000e+00> : vector<4xf32>
    %15 = vector.multi_reduction <add>, %14, %cst_11 [0] : vector<256x4xf32> to vector<4xf32>
    %16 = vector.shape_cast %15 : vector<4xf32> to vector<1x4xf32>
    %17 = arith.addf %13, %16 : vector<1x4xf32>
    %c0_12 = arith.constant 0 : index
    %c0_13 = arith.constant 0 : index
    %c0_14 = arith.constant 0 : index
    %18 = vector.load %arg5[%c0_12, %c0_13, %c0_14] : memref<1x1x4xf32, #tpu.memory_space<vmem>>, vector<1x1x4xf32>
    %19 = vector.shape_cast %18 : vector<1x1x4xf32> to vector<1x4xf32>
    %20 = vector.shape_cast %17 : vector<1x4xf32> to vector<1x1x4xf32>
    tpu.vector_store %arg5[%c0_12, %c0_13, %c0_14], %20 {strides = array<i32>} : memref<1x1x4xf32, #tpu.memory_space<vmem>>, vector<1x1x4xf32>,
    %c0_15 = arith.constant 0 : index
    %c0_16 = arith.constant 0 : index
    %c0_17 = arith.constant 0 : index
    %21 = vector.load %arg6[%c0_15, %c0_16, %c0_17] : memref<1x2x8xf32, #tpu.memory_space<vmem>>, vector<1x2x8xf32>
    %22 = vector.shape_cast %21 : vector<1x2x8xf32> to vector<2x8xf32>
    %cst_18 = arith.constant dense<0.000000e+00> : vector<8xf32>
    %23 = vector.multi_reduction <add>, %11, %cst_18 [0] : vector<256x8xf32> to vector<8xf32>
    %24 = vector.shape_cast %23 : vector<8xf32> to vector<1x8xf32>
    %25 = arith.mulf %11, %11 : vector<256x8xf32>
    %cst_19 = arith.constant dense<0.000000e+00> : vector<8xf32>
    %26 = vector.multi_reduction <add>, %25, %cst_19 [0] : vector<256x8xf32> to vector<8xf32>
    %27 = vector.shape_cast %26 : vector<8xf32> to vector<1x8xf32>
    %28 = tpu.concatenate %24, %27 in 0 : vector<1x8xf32>, vector<1x8xf32> -> vector<2x8xf32>
    %29 = arith.addf %22, %28 : vector<2x8xf32>
    %c0_20 = arith.constant 0 : index
    %c0_21 = arith.constant 0 : index
    %c0_22 = arith.constant 0 : index
    %30 = vector.load %arg6[%c0_20, %c0_21, %c0_22] : memref<1x2x8xf32, #tpu.memory_space<vmem>>, vector<1x2x8xf32>
    %31 = vector.shape_cast %30 : vector<1x2x8xf32> to vector<2x8xf32>
    %32 = vector.shape_cast %29 : vector<2x8xf32> to vector<1x2x8xf32>
    tpu.vector_store %arg6[%c0_20, %c0_21, %c0_22], %32 {strides = array<i32>} : memref<1x2x8xf32, #tpu.memory_space<vmem>>, vector<1x2x8xf32>,
    return
  }
  func.func @transform_0(%arg0: i32, %arg1: i32) -> (i32, i32, i32) {
    %c0_i32 = arith.constant 0 : i32
    %c0_i32_0 = arith.constant 0 : i32
    return %arg0, %arg1, %c0_i32 : i32, i32, i32
  }
  func.func @transform_1(%arg0: i32, %arg1: i32) -> (i32, i32) {
    %c0_i32 = arith.constant 0 : i32
    %c0_i32_0 = arith.constant 0 : i32
    %c0_i32_1 = arith.constant 0 : i32
    return %c0_i32, %c0_i32_0 : i32, i32
  }
  func.func @transform_2(%arg0: i32, %arg1: i32) -> (i32, i32) {
    %c0_i32 = arith.constant 0 : i32
    %c0_i32_0 = arith.constant 0 : i32
    %c0_i32_1 = arith.constant 0 : i32
    return %c0_i32, %c0_i32_0 : i32, i32
  }
  func.func @transform_3(%arg0: i32, %arg1: i32) -> (i32, i32, i32) {
    %c0_i32 = arith.constant 0 : i32
    %c0_i32_0 = arith.constant 0 : i32
    %c0_i32_1 = arith.constant 0 : i32
    return %arg0, %c0_i32, %c0_i32_0 : i32, i32, i32
  }
  func.func @transform_4(%arg0: i32, %arg1: i32) -> (i32, i32, i32) {
    %c0_i32 = arith.constant 0 : i32
    %c0_i32_0 = arith.constant 0 : i32
    %c0_i32_1 = arith.constant 0 : i32
    return %arg0, %c0_i32, %c0_i32_0 : i32, i32, i32
  }
}

</mosaic_0001>

<bundles_post_ra>
// kernel: tpu_custom_call.1
= control target key start
LH: loop header
LB: loop body
LE: loop exit
PB: predicated region body
PF: predicated region fallthrough
CT: control target
= control target key end

     0   :  { %10 = vsyncpa [#allocation3], 0  ;;  %s2430_s0 = inlined_call_operand.vmem [shape: f32[2,256,8], index: 0, kind: input, shape index: {}]   ;;  %s2431_s1 = inlined_call_operand.vmem [shape: f32[8,12], index: 1, kind: input, shape index: {}]   ;;  %s2432_s2 = inlined_call_operand.vmem [shape: f32[4,8], index: 2, kind: input, shape index: {}]   ;;  %s2433_s3 = inlined_call_operand.hbm [shape: f32[2,1,4], index: 3, kind: output, shape index: {0}]   ;;  %s2434_s4 = inlined_call_operand.hbm [shape: f32[2,2,8], index: 4, kind: output, shape index: {1}]  }
   0x1   :  { %12 = vsyncpa [#allocation3 + $0x1], 0 }
   0x2   :  { %13 = vsyncpa [#allocation5], 0 }
   0x3   :  { %15 = vsyncpa [#allocation5 + $0x1], 0  ;;  %s1898_s15 = smov 0   ;;  %s1900_s16 = smov 0  }
   0x4   :  { %s1902_s17 = smov 0   ;;  %s1904_s18 = smov 0  }
   0x5   :  { %s1906_s19 = smov 0   ;;  %s1908_s20 = smov 0  }
   0x6 LB: > { %s1452_s21 = sadd.s32 4294967295, %s1866_s20   ;;  %s1453_s22 = sadd.s32 4294967294, %s1866_s20   ;;  %s1866_s20 = sphi %s1908_s20, %s21_s20   ;;  %s1862_s19 = sphi %s1906_s19, %s2441_s19   ;;  %s1858_s18 = sphi %s1904_s18, %s2440_s18   ;;  %s1854_s17 = sphi %s1902_s17, %s2439_s17   ;;  %s1850_s16 = sphi %s1900_s16, %s2438_s16   ;;  %s1846_s15 = sphi %s1898_s15, %s2437_s15  }
   0x7   : > { %s33_s23 = sadd.s32 1, %s1862_s19  ;;  %s110_s24 = sadd.s32 1, %s1854_s17 }
   0x8   : > { %p35_p0 = scmp.ge.s32.totalorder %s33_s23, 2  ;;  %p120_p1 = scmp.ne.s32.totalorder %s1854_s17, %s1850_s16 }
   0x9   : > { %p121_p2 = scmp.eq.s32.totalorder %s1452_s21, 1  ;;  %p126_p3 = scmp.ne.s32.totalorder %s1850_s16, %s1846_s15 }
   0xa   : > { %s2443_s23 = smov (%p35_p0, %s33_s23), 0  ;;  %p127_p5 = scmp.eq.s32.totalorder %s1453_s22, 1 }
   0xb   : > { %p1938_p4 = por %p121_p2, %p120_p1  ;;  %s107_s26 = ssub.s32 %s1862_s19, %s2443_s23 }
   0xc   : > { %p1456_p6 = scmp.ge.s32.totalorder %s1866_s20, 1  ;;  %p108_p7 = scmp.eq.s32.totalorder %s107_s26, 0 }
   0xd   : > { %p1945_p8 = por %p127_p5, %p126_p3  ;;  %p190_p9 = scmp.lt.s32.totalorder %s1866_s20, 3 }
   0xe   : > { %s1951_s28 = scalar_select %p108_p7, %s1854_s17, %s110_s24  }
   0xf   : > { %p191_p10 = pnand %p1456_p6, %p190_p9 }
  0x10   : > { %p225_p11 = scmp.lt.s32.totalorder (!%p191_p10), %s1858_s18, 1  ;;  %s1868_s12 = smov (!%p191_p10), 124  }
  0x11   : > { %194 = sbr.rel (%p191_p10) target bundleno = 553 (0x229), region = 32  ;;  %s2244_s13 = sand.u32 (!%p191_p10), 1, %s1850_s16  }
  0x12   : > { %s1457_s14 = sshll.u32 (!%p191_p10), %s2244_s13, 1  ;;  %s2295_s22 = scalar_lea.vmem (!%p191_p10), [#allocation2], %s2244_s13 }
  0x13   : > { %s2251_s21 = scalar_lea.vmem (!%p191_p10), [#allocation4], %s1457_s14  ;;  %s1527_s24 = sshll.u32 (!%p191_p10), %s1858_s18, 5 }
  0x14   : > { %s1351_s26 = sshll.u32 (!%p191_p10), %s2251_s21, 4  ;;  %s1871_s8 = smov (!%p191_p10), [#allocation4]   ;;  %s1352_s26 = int_to_ptr.vmem [resolvable:$true] %s1351_s26 }
  0x15   : > { %s1760_s7 = scalar_lea.vmem (!%p191_p10), %s1352_s26, 32 }
  0x16   : > { %v274_v0 = vld [vmem:[%s2431_s1] sm:$0xff]  ;;  %s226_s5 = scalar_select %p225_p11, %s1858_s18, 1  ;;  %vm275_vm0 = vcmask 64512   ;;  %vm695_vm1 = vcmask 1043456   ;;  %vm598_vm2 = vcmask 31744   ;;  %vm1053_vm3 = vcmask 64544  }
  0x17   : > { %1597 = vmatprep.subr.mxu0 %v274_v0  ;;  %v597_v33 = vld [vmem:[%s2432_s2] sm:$0xf]  ;;  %vm240_vm4 = vcmask 58368   ;;  %vm238_vm5 = vcmask 24576   ;;  %vm1315_vm6 = vcmask 1040384   ;;  %p1761_p12 = scmp.ne.s32.totalorder %s1352_s26, %s1760_s7 }
  0x18   : > { %1598 = vmatpush3.msra.mxu0 %v274_v0  ;;  %s1530_s6 = sshll.u32 %s226_s5, 8  ;;  %1647 = vmatprep.subr.msk.mxu1 %vm695_vm1, %v597_v33  ;;  %s1349_s5 = scalar_lea.hbm %s2434_s4, %s1527_s24 }
  0x19   : > { %s1961_s9 = scalar_lea.vmem %s2430_s0, %s1530_s6  ;;  %1648 = vmatpush3.msk.msra.mxu1 %vm695_vm1, %v597_v33  ;;  %s1325_s6 = scalar_lea.sflag [#allocation5], %s2244_s13 }
  0x1a   : > { %v242_v1 = vld [vmem:[%s1961_s9] sm:$0xff]  ;;  %v243_v2 = vld [vmem:[%s1961_s9 + $0x8] sm:$0xff]  ;;  %v244_v3 = vld [vmem:[%s1961_s9 + $0x10] sm:$0xff]  ;;  %p1762_p13 = pnand %p1761_p12, %p1938_p4 }
  0x1b   : > { %1599 = vmatprep.mubr.msk.f32.mxu0 %vm275_vm0, %v242_v1  ;;  %v245_v4 = vld [vmem:[%s1961_s9 + $0x18] sm:$0xff]  ;;  %v246_v5 = vld [vmem:[%s1961_s9 + $0x20] sm:$0xff]  ;;  %v247_v6 = vld [vmem:[%s1961_s9 + $0x28] sm:$0xff] }
  0x1c   : > { %1600 = vmatmul.mubr.msk.f32.vlgmr.msra.gmra.mxu0 %vm275_vm0, %v243_v2  ;;  %v248_v7 = vld [vmem:[%s1961_s9 + $0x30] sm:$0xff]  ;;  %v249_v8 = vld [vmem:[%s1961_s9 + $0x38] sm:$0xff]  ;;  %v250_v9 = vld [vmem:[%s1961_s9 + $0x40] sm:$0xff]  ;;  %p1763_p0 = pneg %p1762_p13 }
  0x1d   : > { %1602 = vmatprep.mubr.msk.f32.mxu0 %vm275_vm0, %v244_v3  ;;  %v251_v10 = vld [vmem:[%s1961_s9 + $0x48] sm:$0xff]  ;;  %v252_v11 = vld [vmem:[%s1961_s9 + $0x50] sm:$0xff]  ;;  %v253_v12 = vld [vmem:[%s1961_s9 + $0x58] sm:$0xff] }
  0x1e   : > { %v254_v13 = vld [vmem:[%s1961_s9 + $0x60] sm:$0xff]  ;;  %v255_v14 = vld [vmem:[%s1961_s9 + $0x68] sm:$0xff]  ;;  %v256_v15 = vld [vmem:[%s1961_s9 + $0x70] sm:$0xff] }
  0x1f   : > { %v257_v16 = vld [vmem:[%s1961_s9 + $0x78] sm:$0xff]  ;;  %v258_v17 = vld [vmem:[%s1961_s9 + $0x80] sm:$0xff]  ;;  %v259_v18 = vld [vmem:[%s1961_s9 + $0x88] sm:$0xff] }
  0x20   : > { %1603 = vmatmul.mubr.msk.f32.gmra.mxu0 %vm275_vm0, %v245_v4  ;;  %v260_v19 = vld [vmem:[%s1961_s9 + $0x90] sm:$0xff]  ;;  %v261_v20 = vld [vmem:[%s1961_s9 + $0x98] sm:$0xff]  ;;  %v262_v21 = vld [vmem:[%s1961_s9 + $0xa0] sm:$0xff] }
  0x21   : > { %1605 = vmatprep.mubr.msk.f32.mxu0 %vm275_vm0, %v246_v5  ;;  %v263_v22 = vld [vmem:[%s1961_s9 + $0xa8] sm:$0xff]  ;;  %v264_v23 = vld [vmem:[%s1961_s9 + $0xb0] sm:$0xff]  ;;  %v265_v24 = vld [vmem:[%s1961_s9 + $0xb8] sm:$0xff] }
  0x22   : > { %v266_v25 = vld [vmem:[%s1961_s9 + $0xc0] sm:$0xff]  ;;  %v267_v26 = vld [vmem:[%s1961_s9 + $0xc8] sm:$0xff]  ;;  %v268_v27 = vld [vmem:[%s1961_s9 + $0xd0] sm:$0xff] }
  0x23   : > { %v269_v28 = vld [vmem:[%s1961_s9 + $0xd8] sm:$0xff]  ;;  %v270_v29 = vld [vmem:[%s1961_s9 + $0xe0] sm:$0xff]  ;;  %v271_v30 = vld [vmem:[%s1961_s9 + $0xe8] sm:$0xff] }
  0x24   : > { %1606 = vmatmul.mubr.msk.f32.gmra.mxu0 %vm275_vm0, %v247_v6  ;;  %v272_v31 = vld [vmem:[%s1961_s9 + $0xf0] sm:$0xff]  ;;  %v273_v32 = vld [vmem:[%s1961_s9 + $0xf8] sm:$0xff]  ;;  %s1764_s9 = sshll.u32 %s1871_s8, 4  ;;  %s1765_s9 = int_to_ptr.vmem [resolvable:$false] %s1764_s9 }
  0x25   : > { %1608 = vmatprep.mubr.msk.f32.mxu0 %vm275_vm0, %v248_v7  ;;  %s1766_s10 = scalar_lea.vmem %s1765_s9, 64  ;;  %p1767_p1 = scmp.lt.s32.totalorder %s1352_s26, %s1765_s9 }
  0x26   : > { %p1768_p2 = scmp.lt.s32.totalorder %s1766_s10, %s1760_s7 }
  0x28   : > { %1609 = vmatmul.mubr.msk.f32.gmra.mxu0 %vm275_vm0, %v249_v8  ;;  %p1769_p3 = por %p1768_p2, %p1767_p1 }
  0x29   : > { %1611 = vmatprep.mubr.msk.f32.mxu0 %vm275_vm0, %v250_v9 }
  0x2a   : > { %p1770_p5 = pnand %p1769_p3, %p1763_p0 }
  0x2c   : > { %1612 = vmatmul.mubr.msk.f32.gmra.mxu0 %vm275_vm0, %v251_v10 }
  0x2d   : > { %1614 = vmatprep.mubr.msk.f32.mxu0 %vm275_vm0, %v252_v11 }
  0x30   : > { %1615 = vmatmul.mubr.msk.f32.gmra.mxu0 %vm275_vm0, %v253_v12 }
  0x31   : > { %1617 = vmatprep.mubr.msk.f32.mxu0 %vm275_vm0, %v254_v13 }
  0x34   : > { %1618 = vmatmul.mubr.msk.f32.gmra.mxu0 %vm275_vm0, %v255_v14 }
  0x35   : > { %1620 = vmatprep.mubr.msk.f32.mxu0 %vm275_vm0, %v256_v15 }
  0x38   : > { %1621 = vmatmul.mubr.msk.f32.gmra.mxu0 %vm275_vm0, %v257_v16 }
  0x39   : > { %1623 = vmatprep.mubr.msk.f32.mxu0 %vm275_vm0, %v258_v17 }
  0x3c   : > { %1624 = vmatmul.mubr.msk.f32.gmra.mxu0 %vm275_vm0, %v259_v18 }
  0x3d   : > { %1626 = vmatprep.mubr.msk.f32.mxu0 %vm275_vm0, %v260_v19 }
  0x40   : > { %1627 = vmatmul.mubr.msk.f32.gmra.mxu0 %vm275_vm0, %v261_v20 }
  0x41   : > { %1629 = vmatprep.mubr.msk.f32.mxu0 %vm275_vm0, %v262_v21 }
  0x44   : > { %1630 = vmatmul.mubr.msk.f32.gmra.mxu0 %vm275_vm0, %v263_v22 }
  0x45   : > { %1632 = vmatprep.mubr.msk.f32.mxu0 %vm275_vm0, %v264_v23 }
  0x48   : > { %1633 = vmatmul.mubr.msk.f32.gmra.mxu0 %vm275_vm0, %v265_v24 }
  0x49   : > { %1635 = vmatprep.mubr.msk.f32.mxu0 %vm275_vm0, %v266_v25 }
  0x4c   : > { %1636 = vmatmul.mubr.msk.f32.gmra.mxu0 %vm275_vm0, %v267_v26 }
  0x4d   : > { %1638 = vmatprep.mubr.msk.f32.mxu0 %vm275_vm0, %v268_v27 }
  0x50   : > { %1639 = vmatmul.mubr.msk.f32.gmra.mxu0 %vm275_vm0, %v269_v28 }
  0x51   : > { %1641 = vmatprep.mubr.msk.f32.mxu0 %vm275_vm0, %v270_v29 }
  0x54   : > { %1642 = vmatmul.mubr.msk.f32.gmra.mxu0 %vm275_vm0, %v271_v30 }
  0x55   : > { %1644 = vmatprep.mubr.msk.f32.mxu0 %vm275_vm0, %v272_v31 }
  0x58   : > { %1645 = vmatmul.mubr.msk.f32.gmra.mxu0 %vm275_vm0, %v273_v32 }
  0xdc   : > { %v2030_v34 = vpop.f32.mrf.mxu0 }
  0xde   : > { %v2032_v35 = vpop.f32.mrf.mxu0 }
  0xdf   : > { %925 = vrot.lane.b32.xlu0 %v2032_v35, %s1868_s12  ;;  %1649 = vmatprep.mubr.msk.f32.mxu1 %vm598_vm2, %v2032_v35 }
  0xe0   : > { %v2038_v36 = vpop.f32.mrf.mxu0  ;;  %1650 = vmatmul.mubr.msk.f32.vlgmr.msra.gmra.mxu1 %vm598_vm2, %v2030_v34 }
  0xe2   : > { %v2042_v37 = vpop.f32.mrf.mxu0 }
  0xe3   : > { %927 = vrot.lane.b32.xlu0 %v2030_v34, %s1868_s12  ;;  %929 = vrot.lane.b32.xlu1 %v2042_v37, %s1868_s12 }
  0xe4   : > { %1652 = vmatprep.mubr.msk.f32.mxu1 %vm598_vm2, %v2042_v37  ;;  %v2050_v38 = vpop.f32.mrf.mxu0 }
  0xe5   : > { %1653 = vmatmul.mubr.msk.f32.gmra.mxu1 %vm598_vm2, %v2038_v36 }
  0xe6   : > { %v2054_v39 = vpop.f32.mrf.mxu0 }
  0xe7   : > { %931 = vrot.lane.b32.xlu1 %v2038_v36, %s1868_s12  ;;  %933 = vrot.lane.b32.xlu0 %v2054_v39, %s1868_s12 }
  0xe8   : > { %1655 = vmatprep.mubr.msk.f32.mxu1 %vm598_vm2, %v2054_v39  ;;  %v2062_v40 = vpop.f32.mrf.mxu0 }
  0xe9   : > { %1656 = vmatmul.mubr.msk.f32.gmra.mxu1 %vm598_vm2, %v2050_v38 }
  0xea   : > { %v2066_v41 = vpop.f32.mrf.mxu0 }
  0xeb   : > { %935 = vrot.lane.b32.xlu1 %v2050_v38, %s1868_s12  ;;  %937 = vrot.lane.b32.xlu0 %v2066_v41, %s1868_s12 }
  0xec   : > { %1658 = vmatprep.mubr.msk.f32.mxu1 %vm598_vm2, %v2066_v41  ;;  %v2074_v42 = vpop.f32.mrf.mxu0 }
  0xed   : > { %1659 = vmatmul.mubr.msk.f32.gmra.mxu1 %vm598_vm2, %v2062_v40 }
  0xee   : > { %v2078_v43 = vpop.f32.mrf.mxu0 }
  0xef   : > { %939 = vrot.lane.b32.xlu1 %v2062_v40, %s1868_s12  ;;  %941 = vrot.lane.b32.xlu0 %v2078_v43, %s1868_s12 }
  0xf0   : > { %1661 = vmatprep.mubr.msk.f32.mxu1 %vm598_vm2, %v2078_v43  ;;  %v2086_v44 = vpop.f32.mrf.mxu0 }
  0xf1   : > { %1662 = vmatmul.mubr.msk.f32.gmra.mxu1 %vm598_vm2, %v2074_v42 }
  0xf2   : > { %v2090_v45 = vpop.f32.mrf.mxu0 }
  0xf3   : > { %943 = vrot.lane.b32.xlu1 %v2074_v42, %s1868_s12  ;;  %945 = vrot.lane.b32.xlu0 %v2090_v45, %s1868_s12 }
  0xf4   : > { %1664 = vmatprep.mubr.msk.f32.mxu1 %vm598_vm2, %v2090_v45  ;;  %v2098_v46 = vpop.f32.mrf.mxu0 }
  0xf5   : > { %1665 = vmatmul.mubr.msk.f32.gmra.mxu1 %vm598_vm2, %v2086_v44 }
  0xf6   : > { %v2102_v47 = vpop.f32.mrf.mxu0 }
  0xf7   : > { %947 = vrot.lane.b32.xlu1 %v2086_v44, %s1868_s12  ;;  %949 = vrot.lane.b32.xlu0 %v2102_v47, %s1868_s12 }
  0xf8   : > { %1667 = vmatprep.mubr.msk.f32.mxu1 %vm598_vm2, %v2102_v47  ;;  %v2110_v48 = vpop.f32.mrf.mxu0 }
  0xf9   : > { %1668 = vmatmul.mubr.msk.f32.gmra.mxu1 %vm598_vm2, %v2098_v46 }
  0xfa   : > { %v2114_v49 = vpop.f32.mrf.mxu0 }
  0xfb   : > { %951 = vrot.lane.b32.xlu1 %v2098_v46, %s1868_s12  ;;  %953 = vrot.lane.b32.xlu0 %v2114_v49, %s1868_s12 }
  0xfc   : > { %1670 = vmatprep.mubr.msk.f32.mxu1 %vm598_vm2, %v2114_v49  ;;  %v2122_v50 = vpop.f32.mrf.mxu0 }
  0xfd   : > { %1671 = vmatmul.mubr.msk.f32.gmra.mxu1 %vm598_vm2, %v2110_v48 }
  0xfe   : > { %v2126_v51 = vpop.f32.mrf.mxu0 }
  0xff   : > { %955 = vrot.lane.b32.xlu1 %v2110_v48, %s1868_s12  ;;  %957 = vrot.lane.b32.xlu0 %v2126_v51, %s1868_s12 }
 0x100   : > { %1673 = vmatprep.mubr.msk.f32.mxu1 %vm598_vm2, %v2126_v51  ;;  %v2134_v52 = vpop.f32.mrf.mxu0 }
 0x101   : > { %1674 = vmatmul.mubr.msk.f32.gmra.mxu1 %vm598_vm2, %v2122_v50 }
 0x102   : > { %v2138_v53 = vpop.f32.mrf.mxu0 }
 0x103   : > { %959 = vrot.lane.b32.xlu1 %v2122_v50, %s1868_s12  ;;  %961 = vrot.lane.b32.xlu0 %v2138_v53, %s1868_s12 }
 0x104   : > { %1676 = vmatprep.mubr.msk.f32.mxu1 %vm598_vm2, %v2138_v53  ;;  %v2146_v54 = vpop.f32.mrf.mxu0 }
 0x105   : > { %1677 = vmatmul.mubr.msk.f32.gmra.mxu1 %vm598_vm2, %v2134_v52 }
 0x106   : > { %v2150_v55 = vpop.f32.mrf.mxu0 }
 0x107   : > { %963 = vrot.lane.b32.xlu1 %v2134_v52, %s1868_s12  ;;  %965 = vrot.lane.b32.xlu0 %v2150_v55, %s1868_s12 }
 0x108   : > { %1679 = vmatprep.mubr.msk.f32.mxu1 %vm598_vm2, %v2150_v55  ;;  %v2158_v56 = vpop.f32.mrf.mxu0 }
 0x109   : > { %1680 = vmatmul.mubr.msk.f32.gmra.mxu1 %vm598_vm2, %v2146_v54 }
 0x10a   : > { %v2162_v57 = vpop.f32.mrf.mxu0 }
 0x10b   : > { %967 = vrot.lane.b32.xlu1 %v2146_v54, %s1868_s12  ;;  %969 = vrot.lane.b32.xlu0 %v2162_v57, %s1868_s12 }
 0x10c   : > { %1682 = vmatprep.mubr.msk.f32.mxu1 %vm598_vm2, %v2162_v57  ;;  %v2170_v58 = vpop.f32.mrf.mxu0 }
 0x10d   : > { %1683 = vmatmul.mubr.msk.f32.gmra.mxu1 %vm598_vm2, %v2158_v56 }
 0x10e   : > { %v2174_v59 = vpop.f32.mrf.mxu0 }
 0x10f   : > { %971 = vrot.lane.b32.xlu1 %v2158_v56, %s1868_s12  ;;  %973 = vrot.lane.b32.xlu0 %v2174_v59, %s1868_s12 }
 0x110   : > { %1685 = vmatprep.mubr.msk.f32.mxu1 %vm598_vm2, %v2174_v59  ;;  %v2182_v60 = vpop.f32.mrf.mxu0 }
 0x111   : > { %1686 = vmatmul.mubr.msk.f32.gmra.mxu1 %vm598_vm2, %v2170_v58 }
 0x112   : > { %v2186_v61 = vpop.f32.mrf.mxu0 }
 0x113   : > { %975 = vrot.lane.b32.xlu1 %v2170_v58, %s1868_s12  ;;  %977 = vrot.lane.b32.xlu0 %v2186_v61, %s1868_s12 }
 0x114   : > { %1688 = vmatprep.mubr.msk.f32.mxu1 %vm598_vm2, %v2186_v61  ;;  %v2194_v62 = vpop.f32.mrf.mxu0 }
 0x115   : > { %1689 = vmatmul.mubr.msk.f32.gmra.mxu1 %vm598_vm2, %v2182_v60 }
 0x116   : > { %v2198_v63 = vpop.f32.mrf.mxu0 }
 0x117   : > { %979 = vrot.lane.b32.xlu1 %v2182_v60, %s1868_s12  ;;  %981 = vrot.lane.b32.xlu0 %v2198_v63, %s1868_s12 }
 0x118   : > { %1691 = vmatprep.mubr.msk.f32.mxu1 %vm598_vm2, %v2198_v63  ;;  %v2206_v0 = vpop.f32.mrf.mxu0 }
 0x119   : > { %1692 = vmatmul.mubr.msk.f32.gmra.mxu1 %vm598_vm2, %v2194_v62 }
 0x11a   : > { %v2210_v1 = vpop.f32.mrf.mxu0 }
 0x11b   : > { %983 = vrot.lane.b32.xlu1 %v2194_v62, %s1868_s12  ;;  %985 = vrot.lane.b32.xlu0 %v2210_v1, %s1868_s12 }
 0x11c   : > { %1694 = vmatprep.mubr.msk.f32.mxu1 %vm598_vm2, %v2210_v1 }
 0x11d   : > { %1695 = vmatmul.mubr.msk.f32.gmra.mxu1 %vm598_vm2, %v2206_v0 }
 0x11f   : > { %987 = vrot.lane.b32.xlu1 %v2206_v0, %s1868_s12 }
 0x151   : > { %v926_v2 = vpop.permute.xlu0 %925 }
 0x152   : > { %v1021_v3 = vmul.f32 %v926_v2, %v2032_v35 }
 0x154   : > { %v1054_v8 = vsel %vm1053_vm3, %v1021_v3, 0.0 }
 0x155   : > { %v928_v4 = vpop.permute.xlu0 %927  ;;  %v930_v5 = vpop.permute.xlu1 %929 }
 0x156   : > { %v1022_v6 = vmul.f32 %v2030_v34, %v928_v4  ;;  %v1023_v7 = vmul.f32 %v930_v5, %v2042_v37 }
 0x158   : > { %v1055_v9 = vsel %vm1053_vm3, %v1022_v6, 0.0  ;;  %v1057_v13 = vsel %vm1053_vm3, %v1023_v7, 0.0 }
 0x159   : > { %v1056_v10 = vadd.f32 %v1055_v9, %v1054_v8  ;;  %v932_v11 = vpop.permute.xlu1 %931  ;;  %v934_v12 = vpop.permute.xlu0 %933 }
 0x15a   : > { %v1024_v14 = vmul.f32 %v2038_v36, %v932_v11  ;;  %v1025_v15 = vmul.f32 %v934_v12, %v2054_v39 }
 0x15b   : > { %v1058_v16 = vadd.f32 %v1057_v13, %v1056_v10 }
 0x15c   : > { %v1059_v17 = vsel %vm1053_vm3, %v1024_v14, 0.0  ;;  %v1061_v21 = vsel %vm1053_vm3, %v1025_v15, 0.0 }
 0x15d   : > { %v1060_v18 = vadd.f32 %v1059_v17, %v1058_v16  ;;  %v936_v19 = vpop.permute.xlu1 %935  ;;  %v938_v20 = vpop.permute.xlu0 %937 }
 0x15e   : > { %v1026_v22 = vmul.f32 %v2050_v38, %v936_v19  ;;  %v1027_v23 = vmul.f32 %v938_v20, %v2066_v41 }
 0x15f   : > { %v1062_v24 = vadd.f32 %v1061_v21, %v1060_v18 }
 0x160   : > { %v1063_v25 = vsel %vm1053_vm3, %v1026_v22, 0.0  ;;  %v1065_v29 = vsel %vm1053_vm3, %v1027_v23, 0.0 }
 0x161   : > { %v1064_v26 = vadd.f32 %v1063_v25, %v1062_v24  ;;  %v940_v27 = vpop.permute.xlu1 %939  ;;  %v942_v28 = vpop.permute.xlu0 %941 }
 0x162   : > { %v1028_v30 = vmul.f32 %v2062_v40, %v940_v27  ;;  %v1029_v31 = vmul.f32 %v942_v28, %v2078_v43 }
 0x163   : > { %v1066_v32 = vadd.f32 %v1065_v29, %v1064_v26 }
 0x164   : > { %v1067_v33 = vsel %vm1053_vm3, %v1028_v30, 0.0  ;;  %v1069_v37 = vsel %vm1053_vm3, %v1029_v31, 0.0 }
 0x165   : > { %v1068_v34 = vadd.f32 %v1067_v33, %v1066_v32  ;;  %v944_v35 = vpop.permute.xlu1 %943  ;;  %v946_v36 = vpop.permute.xlu0 %945 }
 0x166   : > { %v1030_v38 = vmul.f32 %v2074_v42, %v944_v35  ;;  %v1031_v39 = vmul.f32 %v946_v36, %v2090_v45  ;;  %v1869_v45 = vmov 0.0  }
 0x167   : > { %v1070_v41 = vadd.f32 %v1069_v37, %v1068_v34  ;;  %241 = vst.msk [vmem:[%s2251_s21] sm:$0x3] %vm240_vm4, %v1869_v45 }
 0x168   : > { %v1071_v2 = vsel %vm1053_vm3, %v1030_v38, 0.0  ;;  %v1073_v43 = vsel %vm1053_vm3, %v1031_v39, 0.0  ;;  %239 = vst.msk [vmem:[%s2295_s22] sm:$0x1] %vm238_vm5, %v1869_v45 }
 0x169   : > { %v1072_v3 = vadd.f32 %v1071_v2, %v1070_v41  ;;  %v948_v4 = vpop.permute.xlu1 %947  ;;  %v950_v40 = vpop.permute.xlu0 %949 }
 0x16a   : > { %v1032_v5 = vmul.f32 %v2086_v44, %v948_v4  ;;  %v1033_v6 = vmul.f32 %v950_v40, %v2102_v47 }
 0x16b   : > { %v1074_v7 = vadd.f32 %v1073_v43, %v1072_v3 }
 0x16c   : > { %v1075_v42 = vsel %vm1053_vm3, %v1032_v5, 0.0  ;;  %v1077_v11 = vsel %vm1053_vm3, %v1033_v6, 0.0 }
 0x16d   : > { %v1076_v8 = vadd.f32 %v1075_v42, %v1074_v7  ;;  %v952_v9 = vpop.permute.xlu1 %951  ;;  %v954_v10 = vpop.permute.xlu0 %953 }
 0x16e   : > { %v1034_v44 = vmul.f32 %v2098_v46, %v952_v9  ;;  %v1035_v47 = vmul.f32 %v954_v10, %v2114_v49 }
 0x16f   : > { %v1078_v12 = vadd.f32 %v1077_v11, %v1076_v8 }
 0x170   : > { %v1079_v13 = vsel %vm1053_vm3, %v1034_v44, 0.0  ;;  %v1081_v17 = vsel %vm1053_vm3, %v1035_v47, 0.0 }
 0x171   : > { %v1080_v14 = vadd.f32 %v1079_v13, %v1078_v12  ;;  %v956_v15 = vpop.permute.xlu1 %955  ;;  %v958_v16 = vpop.permute.xlu0 %957 }
 0x172   : > { %v1036_v18 = vmul.f32 %v2110_v48, %v956_v15  ;;  %v1037_v19 = vmul.f32 %v958_v16, %v2126_v51 }
 0x173   : > { %v1082_v20 = vadd.f32 %v1081_v17, %v1080_v14 }
 0x174   : > { %v1083_v21 = vsel %vm1053_vm3, %v1036_v18, 0.0  ;;  %v1085_v49 = vsel %vm1053_vm3, %v1037_v19, 0.0 }
 0x175   : > { %v1084_v22 = vadd.f32 %v1083_v21, %v1082_v20  ;;  %v960_v23 = vpop.permute.xlu1 %959  ;;  %v962_v46 = vpop.permute.xlu0 %961 }
 0x176   : > { %v1038_v24 = vmul.f32 %v2122_v50, %v960_v23  ;;  %v1039_v25 = vmul.f32 %v962_v46, %v2138_v53  ;;  %v1870_v46 = vmov 1966171168  }
 0x177   : > { %v1086_v26 = vadd.f32 %v1085_v49, %v1084_v22  ;;  %v1125_v49 = vunpack.c.l.s4 %v1870_v46 }
 0x178   : > { %v1087_v27 = vsel %vm1053_vm3, %v1038_v24, 0.0  ;;  %v1089_v51 = vsel %vm1053_vm3, %v1039_v25, 0.0  ;;  %v1127_v24 = vlaneseq }
 0x179   : > { %v1088_v28 = vadd.f32 %v1087_v27, %v1086_v26  ;;  %v964_v29 = vpop.permute.xlu1 %963  ;;  %v966_v48 = vpop.permute.xlu0 %965  ;;  %v1126_v27 = vunpack.c.0.s8 %v1125_v49 }
 0x17a   : > { %v1040_v30 = vmul.f32 %v2134_v52, %v964_v29  ;;  %v1041_v31 = vmul.f32 %v966_v48, %v2150_v55 }
 0x17b   : > { %v1090_v32 = vadd.f32 %v1089_v51, %v1088_v28  ;;  %v1128_v28 = vshrl.u32 %v1127_v24, 7 }
 0x17c   : > { %v1091_v33 = vsel %vm1053_vm3, %v1040_v30, 0.0  ;;  %v1093_v53 = vsel %vm1053_vm3, %v1041_v31, 0.0 }
 0x17d   : > { %v1092_v34 = vadd.f32 %v1091_v33, %v1090_v32  ;;  %v968_v35 = vpop.permute.xlu1 %967  ;;  %v970_v50 = vpop.permute.xlu0 %969  ;;  %v1129_v48 = vsub.s32 %v1126_v27, %v1128_v28 }
 0x17e   : > { %v1042_v36 = vmul.f32 %v2146_v54, %v968_v35  ;;  %v1043_v37 = vmul.f32 %v970_v50, %v2162_v57 }
 0x17f   : > { %v1094_v38 = vadd.f32 %v1093_v53, %v1092_v34 }
 0x180   : > { %v1095_v39 = vsel %vm1053_vm3, %v1042_v36, 0.0  ;;  %v1097_v55 = vsel %vm1053_vm3, %v1043_v37, 0.0 }
 0x181   : > { %v1096_v41 = vadd.f32 %v1095_v39, %v1094_v38  ;;  %v972_v2 = vpop.permute.xlu1 %971  ;;  %v974_v52 = vpop.permute.xlu0 %973 }
 0x182   : > { %v1044_v3 = vmul.f32 %v2158_v56, %v972_v2  ;;  %v1045_v4 = vmul.f32 %v974_v52, %v2174_v59 }
 0x183   : > { %v1098_v40 = vadd.f32 %v1097_v55, %v1096_v41 }
 0x184   : > { %v1099_v43 = vsel %vm1053_vm3, %v1044_v3, 0.0  ;;  %v1101_v57 = vsel %vm1053_vm3, %v1045_v4, 0.0 }
 0x185   : > { %v1100_v5 = vadd.f32 %v1099_v43, %v1098_v40  ;;  %v976_v6 = vpop.permute.xlu1 %975  ;;  %v978_v54 = vpop.permute.xlu0 %977 }
 0x186   : > { %v1046_v7 = vmul.f32 %v2170_v58, %v976_v6  ;;  %v1047_v42 = vmul.f32 %v978_v54, %v2186_v61 }
 0x187   : > { %v1102_v8 = vadd.f32 %v1101_v57, %v1100_v5 }
 0x188   : > { %v1103_v9 = vsel %vm1053_vm3, %v1046_v7, 0.0  ;;  %v1105_v59 = vsel %vm1053_vm3, %v1047_v42, 0.0 }
 0x189   : > { %v1104_v10 = vadd.f32 %v1103_v9, %v1102_v8  ;;  %v980_v11 = vpop.permute.xlu1 %979  ;;  %v982_v56 = vpop.permute.xlu0 %981 }
 0x18a   : > { %v1048_v44 = vmul.f32 %v2182_v60, %v980_v11  ;;  %v1049_v47 = vmul.f32 %v982_v56, %v2198_v63 }
 0x18b   : > { %v1106_v12 = vadd.f32 %v1105_v59, %v1104_v10 }
 0x18c   : > { %v1107_v13 = vsel %vm1053_vm3, %v1048_v44, 0.0  ;;  %v1109_v61 = vsel %vm1053_vm3, %v1049_v47, 0.0 }
 0x18d   : > { %v1108_v14 = vadd.f32 %v1107_v13, %v1106_v12  ;;  %v984_v58 = vpop.permute.xlu1 %983  ;;  %v986_v15 = vpop.permute.xlu0 %985 }
 0x18e   : > { %v1050_v16 = vmul.f32 %v2194_v62, %v984_v58  ;;  %v1051_v17 = vmul.f32 %v986_v15, %v2210_v1 }
 0x18f   : > { %v1110_v18 = vadd.f32 %v1109_v61, %v1108_v14 }
 0x190   : > { %v1111_v19 = vsel %vm1053_vm3, %v1050_v16, 0.0  ;;  %v1113_v63 = vsel %vm1053_vm3, %v1051_v17, 0.0 }
 0x191   : > { %v1112_v60 = vadd.f32 %v1111_v19, %v1110_v18  ;;  %v988_v20 = vpop.permute.xlu1 %987 }
 0x192   : > { %v1052_v21 = vmul.f32 %v2206_v0, %v988_v20 }
 0x193   : > { %v1114_v22 = vadd.f32 %v1113_v63, %v1112_v60 }
 0x194   : > { %v1115_v62 = vsel %vm1053_vm3, %v1052_v21, 0.0 }
 0x195   : > { %v1116_v1 = vadd.f32 %v1115_v62, %v1114_v22 }
 0x197   : > { %v1117_v23 = vrot.slane %v1116_v1, 4 }
 0x199   : > { %v1118_v25 = vadd.f32 %v1117_v23, %v1116_v1 }
 0x19b   : > { %v1119_v26 = vrot.slane %v1118_v25, 2 }
 0x19d   : > { %v1120_v29 = vadd.f32 %v1119_v26, %v1118_v25 }
 0x19f   : > { %v1121_v0 = vrot.slane %v1120_v29, 1 }
 0x1a0   : > { %v1651_v51 = vpop.f32.mrf.mxu1 }
 0x1a1   : > { %v1122_v30 = vadd.f32 %v1121_v0, %v1120_v29  ;;  %v1215_v45 = vmul.f32 %v1651_v51, %v1651_v51  ;;  %v1146_v53 = vsel %vm275_vm0, %v1651_v51, 0.0 }
 0x1a2   : > { %v765_v31 = vpop.f32.mrf.mxu1 }
 0x1a3   : > { %v1214_v32 = vmul.f32 %v765_v31, %v765_v31  ;;  %v1130_v33 = vrot.slane %v1122_v30, %v1129_v48  ;;  %v1145_v34 = vsel %vm275_vm0, %v765_v31, 0.0  ;;  %v1247_v39 = vsel %vm275_vm0, %v1215_v45, 0.0 }
 0x1a4   : > { %v1147_v37 = vadd.f32 %v1146_v53, %v1145_v34 }
 0x1a5   : > { %v1654_v35 = vpop.f32.mrf.mxu1  ;;  %v1137_v50 = vrot.slane %v1130_v33, %v1129_v48  ;;  %v1246_v36 = vsel %vm275_vm0, %v1214_v32, 0.0 }
 0x1a6   : > { %v1217_v41 = vmul.f32 %v1654_v35, %v1654_v35  ;;  %v1248_v55 = vadd.f32 %v1247_v39, %v1246_v36  ;;  %v1150_v40 = vsel %vm275_vm0, %v1654_v35, 0.0 }
 0x1a7   : > { %v775_v38 = vpop.f32.mrf.mxu1  ;;  %1138 = vrot.lane.b32.xlu0 %v1137_v50, %s1868_s12 }
 0x1a8   : > { %v1148_v2 = vsel %vm275_vm0, %v775_v38, 0.0  ;;  %v1216_v52 = vmul.f32 %v775_v38, %v775_v38  ;;  %v1251_v57 = vsel %vm275_vm0, %v1217_v41, 0.0 }
 0x1a9   : > { %v1149_v3 = vadd.f32 %v1148_v2, %v1147_v37  ;;  %v1657_v4 = vpop.f32.mrf.mxu1 }
 0x1aa   : > { %v1249_v43 = vsel %vm275_vm0, %v1216_v52, 0.0  ;;  %v1219_v7 = vmul.f32 %v1657_v4, %v1657_v4  ;;  %v1154_v56 = vsel %vm275_vm0, %v1657_v4, 0.0 }
 0x1ab   : > { %v1250_v5 = vadd.f32 %v1249_v43, %v1248_v55  ;;  %v785_v6 = vpop.f32.mrf.mxu1  ;;  %v1151_v54 = vadd.f32 %v1150_v40, %v1149_v3 }
 0x1ac   : > { %v1152_v42 = vsel %vm275_vm0, %v785_v6, 0.0  ;;  %v1218_v8 = vmul.f32 %v785_v6, %v785_v6  ;;  %v1255_v13 = vsel %vm275_vm0, %v1219_v7, 0.0 }
 0x1ad   : > { %v1153_v9 = vadd.f32 %v1152_v42, %v1151_v54  ;;  %v1252_v10 = vadd.f32 %v1251_v57, %v1250_v5  ;;  %v1660_v11 = vpop.f32.mrf.mxu1 }
 0x1ae   : > { %v1253_v59 = vsel %vm275_vm0, %v1218_v8, 0.0  ;;  %v1221_v14 = vmul.f32 %v1660_v11, %v1660_v11  ;;  %v1158_v18 = vsel %vm275_vm0, %v1660_v11, 0.0 }
 0x1af   : > { %v1254_v44 = vadd.f32 %v1253_v59, %v1252_v10  ;;  %v795_v47 = vpop.f32.mrf.mxu1  ;;  %v1155_v12 = vadd.f32 %v1154_v56, %v1153_v9 }
 0x1b0   : > { %v1156_v58 = vsel %vm275_vm0, %v795_v47, 0.0  ;;  %v1220_v15 = vmul.f32 %v795_v47, %v795_v47  ;;  %v1259_v21 = vsel %vm275_vm0, %v1221_v14, 0.0 }
 0x1b1   : > { %v1157_v61 = vadd.f32 %v1156_v58, %v1155_v12  ;;  %v1256_v16 = vadd.f32 %v1255_v13, %v1254_v44  ;;  %v1663_v17 = vpop.f32.mrf.mxu1 }
 0x1b2   : > { %v1257_v19 = vsel %vm275_vm0, %v1220_v15, 0.0  ;;  %v1223_v22 = vmul.f32 %v1663_v17, %v1663_v17  ;;  %v1162_v24 = vsel %vm275_vm0, %v1663_v17, 0.0 }
 0x1b3   : > { %v1258_v60 = vadd.f32 %v1257_v19, %v1256_v16  ;;  %v805_v20 = vpop.f32.mrf.mxu1  ;;  %v1159_v63 = vadd.f32 %v1158_v18, %v1157_v61 }
 0x1b4   : > { %v1160_v62 = vsel %vm275_vm0, %v805_v20, 0.0  ;;  %v1222_v1 = vmul.f32 %v805_v20, %v805_v20  ;;  %v1263_v29 = vsel %vm275_vm0, %v1223_v22, 0.0 }
 0x1b5   : > { %v1161_v23 = vadd.f32 %v1160_v62, %v1159_v63  ;;  %v1260_v46 = vadd.f32 %v1259_v21, %v1258_v60  ;;  %v1666_v49 = vpop.f32.mrf.mxu1 }
 0x1b6   : > { %v1261_v25 = vsel %vm275_vm0, %v1222_v1, 0.0  ;;  %v1225_v0 = vmul.f32 %v1666_v49, %v1666_v49  ;;  %v1166_v33 = vsel %vm275_vm0, %v1666_v49, 0.0 }
 0x1b7   : > { %v1262_v26 = vadd.f32 %v1261_v25, %v1260_v46  ;;  %v815_v27 = vpop.f32.mrf.mxu1  ;;  %v1163_v28 = vadd.f32 %v1162_v24, %v1161_v23 }
 0x1b8   : > { %v1164_v48 = vsel %vm275_vm0, %v815_v27, 0.0  ;;  %v1224_v51 = vmul.f32 %v815_v27, %v815_v27  ;;  %v1267_v53 = vsel %vm275_vm0, %v1225_v0, 0.0 }
 0x1b9   : > { %v1165_v30 = vadd.f32 %v1164_v48, %v1163_v28  ;;  %v1264_v31 = vadd.f32 %v1263_v29, %v1262_v26  ;;  %v1669_v32 = vpop.f32.mrf.mxu1 }
 0x1ba   : > { %v1265_v45 = vsel %vm275_vm0, %v1224_v51, 0.0  ;;  %v1227_v36 = vmul.f32 %v1669_v32, %v1669_v32  ;;  %v1170_v52 = vsel %vm275_vm0, %v1669_v32, 0.0 }
 0x1bb   : > { %v1266_v34 = vadd.f32 %v1265_v45, %v1264_v31  ;;  %v825_v35 = vpop.f32.mrf.mxu1  ;;  %v1167_v50 = vadd.f32 %v1166_v33, %v1165_v30 }
 0x1bc   : > { %v1168_v37 = vsel %vm275_vm0, %v825_v35, 0.0  ;;  %v1226_v38 = vmul.f32 %v825_v35, %v825_v35  ;;  %v1271_v43 = vsel %vm275_vm0, %v1227_v36, 0.0 }
 0x1bd   : > { %v1169_v39 = vadd.f32 %v1168_v37, %v1167_v50  ;;  %v1268_v41 = vadd.f32 %v1267_v53, %v1266_v34  ;;  %v1672_v2 = vpop.f32.mrf.mxu1 }
 0x1be   : > { %v1269_v55 = vsel %vm275_vm0, %v1226_v38, 0.0  ;;  %v1229_v5 = vmul.f32 %v1672_v2, %v1672_v2  ;;  %v1174_v8 = vsel %vm275_vm0, %v1672_v2, 0.0 }
 0x1bf   : > { %v1270_v3 = vadd.f32 %v1269_v55, %v1268_v41  ;;  %v835_v4 = vpop.f32.mrf.mxu1  ;;  %v1171_v40 = vadd.f32 %v1170_v52, %v1169_v39 }
 0x1c0   : > { %v1172_v6 = vsel %vm275_vm0, %v835_v4, 0.0  ;;  %v1228_v54 = vmul.f32 %v835_v4, %v835_v4  ;;  %v1275_v59 = vsel %vm275_vm0, %v1229_v5, 0.0 }
 0x1c1   : > { %v1173_v57 = vadd.f32 %v1172_v6, %v1171_v40  ;;  %v1272_v7 = vadd.f32 %v1271_v43, %v1270_v3  ;;  %v1675_v42 = vpop.f32.mrf.mxu1 }
 0x1c2   : > { %v1273_v9 = vsel %vm275_vm0, %v1228_v54, 0.0  ;;  %v1231_v44 = vmul.f32 %v1675_v42, %v1675_v42  ;;  %v1178_v15 = vsel %vm275_vm0, %v1675_v42, 0.0 }
 0x1c3   : > { %v1274_v10 = vadd.f32 %v1273_v9, %v1272_v7  ;;  %v845_v11 = vpop.f32.mrf.mxu1  ;;  %v1175_v56 = vadd.f32 %v1174_v8, %v1173_v57 }
 0x1c4   : > { %v1176_v47 = vsel %vm275_vm0, %v845_v11, 0.0  ;;  %v1230_v12 = vmul.f32 %v845_v11, %v845_v11  ;;  %v1279_v19 = vsel %vm275_vm0, %v1231_v44, 0.0 }
 0x1c5   : > { %v1177_v13 = vadd.f32 %v1176_v47, %v1175_v56  ;;  %v1276_v14 = vadd.f32 %v1275_v59, %v1274_v10  ;;  %v1678_v58 = vpop.f32.mrf.mxu1 }
 0x1c6   : > { %v1277_v61 = vsel %vm275_vm0, %v1230_v12, 0.0  ;;  %v1233_v60 = vmul.f32 %v1678_v58, %v1678_v58  ;;  %v1182_v1 = vsel %vm275_vm0, %v1678_v58, 0.0 }
 0x1c7   : > { %v1278_v16 = vadd.f32 %v1277_v61, %v1276_v14  ;;  %v855_v17 = vpop.f32.mrf.mxu1  ;;  %v1179_v18 = vadd.f32 %v1178_v15, %v1177_v13 }
 0x1c8   : > { %v1180_v20 = vsel %vm275_vm0, %v855_v17, 0.0  ;;  %v1232_v63 = vmul.f32 %v855_v17, %v855_v17  ;;  %v1283_v25 = vsel %vm275_vm0, %v1233_v60, 0.0 }
 0x1c9   : > { %v1181_v21 = vadd.f32 %v1180_v20, %v1179_v18  ;;  %v1280_v22 = vadd.f32 %v1279_v19, %v1278_v16  ;;  %v1681_v62 = vpop.f32.mrf.mxu1 }
 0x1ca   : > { %v1281_v23 = vsel %vm275_vm0, %v1232_v63, 0.0  ;;  %v1235_v26 = vmul.f32 %v1681_v62, %v1681_v62  ;;  %v1186_v51 = vsel %vm275_vm0, %v1681_v62, 0.0 }
 0x1cb   : > { %v1282_v46 = vadd.f32 %v1281_v23, %v1280_v22  ;;  %v865_v49 = vpop.f32.mrf.mxu1  ;;  %v1183_v24 = vadd.f32 %v1182_v1, %v1181_v21 }
 0x1cc   : > { %v1184_v27 = vsel %vm275_vm0, %v865_v49, 0.0  ;;  %v1234_v28 = vmul.f32 %v865_v49, %v865_v49  ;;  %v1287_v45 = vsel %vm275_vm0, %v1235_v26, 0.0 }
 0x1cd   : > { %v1185_v29 = vadd.f32 %v1184_v27, %v1183_v24  ;;  %v1284_v0 = vadd.f32 %v1283_v25, %v1282_v46  ;;  %v1684_v48 = vpop.f32.mrf.mxu1 }
 0x1ce   : > { %v1285_v30 = vsel %vm275_vm0, %v1234_v28, 0.0  ;;  %v1237_v34 = vmul.f32 %v1684_v48, %v1684_v48  ;;  %v1190_v38 = vsel %vm275_vm0, %v1684_v48, 0.0 }
 0x1cf   : > { %v1286_v31 = vadd.f32 %v1285_v30, %v1284_v0  ;;  %v875_v32 = vpop.f32.mrf.mxu1  ;;  %v1187_v33 = vadd.f32 %v1186_v51, %v1185_v29 }
 0x1d0   : > { %v1188_v35 = vsel %vm275_vm0, %v875_v32, 0.0  ;;  %v1236_v50 = vmul.f32 %v875_v32, %v875_v32  ;;  %v1291_v55 = vsel %vm275_vm0, %v1237_v34, 0.0 }
 0x1d1   : > { %v1189_v53 = vadd.f32 %v1188_v35, %v1187_v33  ;;  %v1288_v36 = vadd.f32 %v1287_v45, %v1286_v31  ;;  %v1687_v37 = vpop.f32.mrf.mxu1 }
 0x1d2   : > { %v1289_v39 = vsel %vm275_vm0, %v1236_v50, 0.0  ;;  %v1239_v3 = vmul.f32 %v1687_v37, %v1687_v37  ;;  %v1194_v54 = vsel %vm275_vm0, %v1687_v37, 0.0 }
 0x1d3   : > { %v1290_v41 = vadd.f32 %v1289_v39, %v1288_v36  ;;  %v885_v2 = vpop.f32.mrf.mxu1  ;;  %v1191_v52 = vadd.f32 %v1190_v38, %v1189_v53  ;;  %v1144_v39 = vld [vmem:[%s2251_s21] sm:$0x3] }
 0x1d4   : > { %v1192_v4 = vsel %vm275_vm0, %v885_v2, 0.0  ;;  %v1238_v40 = vmul.f32 %v885_v2, %v885_v2  ;;  %v1295_v9 = vsel %vm275_vm0, %v1239_v3, 0.0 }
 0x1d5   : > { %v1193_v43 = vadd.f32 %v1192_v4, %v1191_v52  ;;  %v1292_v5 = vadd.f32 %v1291_v55, %v1290_v41  ;;  %v1690_v6 = vpop.f32.mrf.mxu1 }
 0x1d6   : > { %v1293_v57 = vsel %vm275_vm0, %v1238_v40, 0.0  ;;  %v1241_v10 = vmul.f32 %v1690_v6, %v1690_v6  ;;  %v1198_v12 = vsel %vm275_vm0, %v1690_v6, 0.0 }
 0x1d7   : > { %v1294_v7 = vadd.f32 %v1293_v57, %v1292_v5  ;;  %v895_v42 = vpop.f32.mrf.mxu1  ;;  %v1195_v8 = vadd.f32 %v1194_v54, %v1193_v43 }
 0x1d8   : > { %v1196_v11 = vsel %vm275_vm0, %v895_v42, 0.0  ;;  %v1240_v56 = vmul.f32 %v895_v42, %v895_v42  ;;  %v1299_v61 = vsel %vm275_vm0, %v1241_v10, 0.0 }
 0x1d9   : > { %v1197_v59 = vadd.f32 %v1196_v11, %v1195_v8  ;;  %v1296_v44 = vadd.f32 %v1295_v9, %v1294_v7  ;;  %v1693_v47 = vpop.f32.mrf.mxu1 }
 0x1da   : > { %v1297_v13 = vsel %vm275_vm0, %v1240_v56, 0.0  ;;  %v1243_v16 = vmul.f32 %v1693_v47, %v1693_v47  ;;  %v1202_v63 = vsel %vm275_vm0, %v1693_v47, 0.0 }
 0x1db   : > { %v1298_v14 = vadd.f32 %v1297_v13, %v1296_v44  ;;  %v905_v58 = vpop.f32.mrf.mxu1  ;;  %v1199_v15 = vadd.f32 %v1198_v12, %v1197_v59 }
 0x1dc   : > { %v1200_v17 = vsel %vm275_vm0, %v905_v58, 0.0  ;;  %v1242_v18 = vmul.f32 %v905_v58, %v905_v58  ;;  %v1303_v23 = vsel %vm275_vm0, %v1243_v16, 0.0 }
 0x1dd   : > { %v1201_v19 = vadd.f32 %v1200_v17, %v1199_v15  ;;  %v1300_v60 = vadd.f32 %v1299_v61, %v1298_v14  ;;  %v1696_v20 = vpop.f32.mrf.mxu1 }
 0x1de   : > { %v1301_v21 = vsel %vm275_vm0, %v1242_v18, 0.0  ;;  %v1245_v46 = vmul.f32 %v1696_v20, %v1696_v20  ;;  %v1206_v27 = vsel %vm275_vm0, %v1696_v20, 0.0 }
 0x1df   : > { %v1302_v22 = vadd.f32 %v1301_v21, %v1300_v60  ;;  %v915_v62 = vpop.f32.mrf.mxu1  ;;  %v1203_v1 = vadd.f32 %v1202_v63, %v1201_v19 }
 0x1e0   : > { %v1204_v49 = vsel %vm275_vm0, %v915_v62, 0.0  ;;  %v1244_v24 = vmul.f32 %v915_v62, %v915_v62  ;;  %v1307_v48 = vsel %vm275_vm0, %v1245_v46, 0.0 }
 0x1e1   : > { %v1205_v25 = vadd.f32 %v1204_v49, %v1203_v1  ;;  %v1304_v26 = vadd.f32 %v1303_v23, %v1302_v22 }
 0x1e2   : > { %v1305_v28 = vsel %vm275_vm0, %v1244_v24, 0.0 }
 0x1e3   : > { %v1207_v29 = vadd.f32 %v1206_v27, %v1205_v25  ;;  %v1306_v0 = vadd.f32 %v1305_v28, %v1304_v26 }
 0x1e5   : > { %v1208_v51 = vrot.slane %v1207_v29, 4  ;;  %v1308_v30 = vadd.f32 %v1307_v48, %v1306_v0 }
 0x1e7   : > { %v1209_v31 = vadd.f32 %v1208_v51, %v1207_v29  ;;  %v1309_v32 = vrot.slane %v1308_v30, 4 }
 0x1e9   : > { %v1210_v33 = vrot.slane %v1209_v31, 2  ;;  %v1310_v45 = vadd.f32 %v1309_v32, %v1308_v30 }
 0x1eb   : > { %v1211_v34 = vadd.f32 %v1210_v33, %v1209_v31  ;;  %v1311_v35 = vrot.slane %v1310_v45, 2 }
 0x1ed   : > { %v1212_v50 = vrot.slane %v1211_v34, 1  ;;  %v1312_v53 = vadd.f32 %v1311_v35, %v1310_v45 }
 0x1ef   : > { %v1313_v36 = vrot.slane %v1312_v53, 1  ;;  %v1213_v37 = vadd.f32 %v1212_v50, %v1211_v34 }
 0x1f1   : > { %v1314_v38 = vadd.f32 %v1313_v36, %v1312_v53 }
 0x1f3   : > { %v1316_v41 = vsel %vm1315_vm6, %v1213_v37, %v1314_v38 }
 0x1f4   : > { %v1317_v2 = vadd.f32 %v1316_v41, %v1144_v39 }
 0x1f6   : > { %1319 = vst.msk [vmem:[%s2251_s21] sm:$0x3] %vm240_vm4, %v1317_v2 }
 0x1f7   : > { %1773 = shalt.err (!%p1770_p5)
}
 0x1f8   : > { %s1774_s11 = scalar_lea.hbm %s1349_s5, 32  ;;  %s1778_s21 = scalar_lea.hbm %s2434_s4, 64 }
 0x1f9   : > { %p1775_p6 = scmp.ne.s32.totalorder %s1349_s5, %s1774_s11  ;;  %p1779_p10 = scmp.lt.s32.totalorder %s1349_s5, %s2434_s4 }
 0x1fa   : > { %p1780_p11 = scmp.lt.s32.totalorder %s1778_s21, %s1774_s11 }
 0x1fb   : > { %p1776_p7 = pnand %p1775_p6, %p1938_p4 }
 0x1fc   : > { %p1781_p12 = por %p1780_p11, %p1779_p10 }
 0x1fd   : > { %p1777_p9 = pneg %p1776_p7 }
 0x1ff   : > { %p1782_p13 = pnand %p1781_p12, %p1777_p9 }
 0x201   : > { %1785 = shalt.err (!%p1782_p13)
}
 0x202   : > { %1698 = dma.vmem_to_hbm [thread:$0]  (%p1938_p4), %s1352_s26, 32, %s1349_s5, %s1325_s6   ;;  %v924_v52 = vld [vmem:[%s2295_s22] sm:$0x1] }
 0x203   : > { %s1526_s30 = sshll.u32 %s1858_s18, 4  ;;  %s1338_s7 = sshll.u32 %s2295_s22, 4  ;;  %s1339_s7 = int_to_ptr.vmem [resolvable:$true] %s1338_s7 }
 0x204   : > { %s1336_s10 = scalar_lea.hbm %s2433_s3, %s1526_s30  ;;  %s1321_s11 = scalar_lea.sflag [#allocation3], %s2244_s13 }
 0x205   : > { %s1786_s12 = scalar_lea.vmem %s1339_s7, 16  ;;  %s1872_s14 = smov [#allocation2]  }
 0x206   : > { %p1787_p0 = scmp.ne.s32.totalorder %s1339_s7, %s1786_s12  ;;  %s1790_s26 = sshll.u32 %s1872_s14, 4  ;;  %s1791_s26 = int_to_ptr.vmem [resolvable:$false] %s1790_s26 }
 0x207   : > { %s1792_s18 = scalar_lea.vmem %s1791_s26, 32  ;;  %p1793_p3 = scmp.lt.s32.totalorder %s1339_s7, %s1791_s26 }
 0x208   : > { %p1788_p1 = pnand %p1787_p0, %p1938_p4  ;;  %p1794_p5 = scmp.lt.s32.totalorder %s1792_s18, %s1786_s12 }
 0x20a   : > { %p1789_p2 = pneg %p1788_p1  ;;  %p1795_p6 = por %p1794_p5, %p1793_p3 }
 0x20c   : > { %p1796_p7 = pnand %p1795_p6, %p1789_p2 }
 0x219   : > { %v1139_v55 = vpop.permute.xlu0 %1138 }
 0x21a   : > { %v1141_v3 = vadd.f32 %v1139_v55, %v924_v52 }
 0x21c   : > { %1143 = vst.msk [vmem:[%s2295_s22] sm:$0x1] %vm238_vm5, %v1141_v3 }
 0x21d   : > { %1799 = shalt.err (!%p1796_p7)
}
 0x21e   : > { %s1800_s5 = scalar_lea.hbm %s1336_s10, 16  ;;  %s1804_s6 = scalar_lea.hbm %s2433_s3, 32 }
 0x21f   : > { %p1801_p9 = scmp.ne.s32.totalorder %s1336_s10, %s1800_s5  ;;  %p1805_p12 = scmp.lt.s32.totalorder %s1336_s10, %s2433_s3 }
 0x220   : > { %p1806_p13 = scmp.lt.s32.totalorder %s1804_s6, %s1800_s5 }
 0x221   : > { %p1802_p10 = pnand %p1801_p9, %p1938_p4 }
 0x222   : > { %p1807_p0 = por %p1806_p13, %p1805_p12 }
 0x223   : > { %p1803_p11 = pneg %p1802_p10 }
 0x225   : > { %p1808_p1 = pnand %p1807_p0, %p1803_p11 }
 0x227   : > { %1811 = shalt.err (!%p1808_p1)
}
 0x228   : > { %1697 = dma.vmem_to_hbm [thread:$0]  (%p1938_p4), %s1339_s7, 16, %s1336_s10, %s1321_s11  }
 0x229 PF: > { %p1708_p2 = scmp.ge.s32.totalorder %s1866_s20, 2  ;;  %s1363_s29 = sand.u32 1, %s1846_s15  }
 0x22a   : > { %s1364_s30 = scalar_lea.sflag [#allocation3], %s1363_s29 }
 0x22b   : > { %p1702_p3 = pnand %p1708_p2, %p1945_p8 }
 0x22d   : > { %p1703_p5 = pneg %p1702_p3 }
 0x22f   : > { %1837 = dma.done.wait (%p1703_p5), %s1364_s30, 16  }
 0x230   : > { %1839 = vsyncadd (%p1703_p5), %s1364_s30, 4294967280  ;;  %s1372_s8 = scalar_lea.sflag [#allocation5], %s1363_s29 }
 0x231   : > { %1841 = dma.done.wait (%p1703_p5), %s1372_s8, 32  }
 0x232   : > { %1843 = vsyncadd (%p1703_p5), %s1372_s8, 4294967264  ;;  %s21_s20 = sadd.s32 1, %s1866_s20   ;;  %s2437_s15 = smov %s1850_s16 }
 0x233   : > { %p18_p6 = scmp.ge.s32.totalorder %s21_s20, 4   ;;  %s2438_s16 = smov %s1854_s17 }
 0x234   : > { %s2439_s17 = smov %s1951_s28  ;;  %s2440_s18 = smov %s1862_s19 }
 0x235   : > { %s2441_s19 = smov %s2443_s23  ;;  %20 = sbr.rel (!%p18_p6) target bundleno = 6 (0x6), region = 88 }
 0x23a   :  { %1377 = vsyncpa [#allocation3], 1 }
 0x23b   :  { %1379 = vsyncpa [#allocation3 + $0x1], 1 }
 0x23c   :  { %1380 = vsyncpa [#allocation5], 1 }
 0x23d   :  { %1382 = vsyncpa [#allocation5 + $0x1], 1 }

</bundles_post_ra>
